<compile_context>
chip_gen: v7x
topology: tpu7x:2x2x1
jax: 0.10.0
libtpu: 0.0.40
codegen_flags: <defaults>
</compile_context>

<pallas_src>
import functools

import jax
import jax.numpy as jnp
from jax import lax
from jax.experimental import pallas as pl
from jax.experimental.pallas import tpu as pltpu


def _label_smoothing_kernel(x_ref, tgt_ref, out_ref, *, smoothing: float,
                            n_total: int, tile_n: int, chunk_c: int):
    confidence = 1.0 - smoothing
    tn = tile_n
    c = x_ref.shape[-1]
    n_full = c // chunk_c          # full 128-aligned chunks (static)
    tail = c - n_full * chunk_c    # static remainder

    tgt = tgt_ref[...]                                        # (tn, 1) int32

    neg_inf = jnp.full((tn, 1), -jnp.inf, dtype=jnp.float32)
    zeros = jnp.zeros((tn, 1), dtype=jnp.float32)

    def chunk_stats(xk, ids, start):
        # Per-chunk: max, plain sum, and one-hot gathered x[row, target[row]].
        mk = jnp.max(xk, axis=-1, keepdims=True)
        sk = jnp.sum(xk, axis=-1, keepdims=True)
        tk = jnp.sum(jnp.where((ids + start) == tgt, xk, 0.0),
                     axis=-1, keepdims=True)
        return mk, sk, tk

    m, row_sum, x_tgt = neg_inf, zeros, zeros

    # ---- Pass 1: running max, row sum, x[target] (chunked over C) ----
    if n_full > 0:
        # Loop-invariant column iota, hoisted out of the chunk loop.
        col_ids = lax.broadcasted_iota(jnp.int32, (tn, chunk_c), 1)

        def pass1(kc, carry):
            mi, rs, xt = carry
            start = pl.multiple_of(kc * chunk_c, chunk_c)
            xk = x_ref[:, pl.ds(start, chunk_c)].astype(jnp.float32)
            mk, sk, tk = chunk_stats(xk, col_ids, start)
            return jnp.maximum(mi, mk), rs + sk, xt + tk

        m, row_sum, x_tgt = lax.fori_loop(
            0, n_full, pass1, (m, row_sum, x_tgt), unroll=n_full <= 8)

    if tail > 0:
        ids_t = lax.broadcasted_iota(jnp.int32, (tn, tail), 1)
        xk = x_ref[:, pl.ds(n_full * chunk_c, tail)].astype(jnp.float32)
        mk, sk, tk = chunk_stats(xk, ids_t, n_full * chunk_c)
        m = jnp.maximum(m, mk)
        row_sum = row_sum + sk
        x_tgt = x_tgt + tk

    # ---- Pass 2: sum(exp(x - m)) (re-reads served from VMEM) ----
    s_exp = zeros
    if n_full > 0:
        def pass2(kc, s):
            start = pl.multiple_of(kc * chunk_c, chunk_c)
            xk = x_ref[:, pl.ds(start, chunk_c)].astype(jnp.float32)
            return s + jnp.sum(jnp.exp(xk - m), axis=-1, keepdims=True)

        s_exp = lax.fori_loop(0, n_full, pass2, s_exp, unroll=n_full <= 8)

    if tail > 0:
        xk = x_ref[:, pl.ds(n_full * chunk_c, tail)].astype(jnp.float32)
        s_exp = s_exp + jnp.sum(jnp.exp(xk - m), axis=-1, keepdims=True)

    lse = jnp.log(s_exp)                                      # (tn, 1)

    # Fused epilogue:
    #   conf*(m+lse-x_tgt) + smooth*(m+lse-row_sum/C)
    # = (m+lse) - conf*x_tgt - (smooth/C)*row_sum
    loss = (m + lse) - confidence * x_tgt - (smoothing / c) * row_sum

    # Mask rows beyond the true batch size (ragged last tile reads padding).
    row_ids = (lax.broadcasted_iota(jnp.int32, (tn, 1), 0)
               + pl.program_id(0) * tile_n)
    loss = jnp.where(row_ids < n_total, loss, 0.0)

    # Lane-dense (8,128) block: unmasked vector store, independent per tile.
    out_ref[...] = jnp.full((8, 128), jnp.sum(loss), dtype=jnp.float32)


def _choose_tile_n(n: int, c: int, itemsize: int) -> int:
    # ~4 MiB per input buffer: double-buffered it stays far below v7x's 64 MiB
    # VMEM (and under the 32 MiB default scoped limit with the chunked upcast).
    budget = 4 * 1024 * 1024
    tile = budget // max(1, c * itemsize)
    tile = max(8, min(1024, (tile // 8) * 8))
    n_pad8 = -(-n // 8) * 8
    tile = min(tile, n_pad8)
    # Guarantee >=2 grid steps when N allows: enables megacore sharding of the
    # 'parallel' axis on v7x and hides the input DMA behind compute everywhere.
    if tile == n_pad8 and n_pad8 >= 16:
        tile = -(-(n_pad8 // 2) // 8) * 8
    return int(tile)


def label_smoothing_loss(x, target, smoothing: float = 0.1,
                         tile_n=None, chunk_c=None):
    """x: (N, C) float (any float dtype), target: (N,) int -> scalar f32 loss."""
    n, c = x.shape
    itemsize = jnp.dtype(x.dtype).itemsize
    tgt2d = target.astype(jnp.int32).reshape(n, 1)

    if tile_n is None:
        tile_n = _choose_tile_n(n, c, itemsize)
    tile_n = int(tile_n)
    num_tiles = int(pl.cdiv(n, tile_n))

    if chunk_c is None:
        chunk_c = 512
    chunk_c = max(128, (int(chunk_c) // 128) * 128)   # 128-aligned lane chunks

    kernel = functools.partial(
        _label_smoothing_kernel, smoothing=float(smoothing), n_total=n,
        tile_n=tile_n, chunk_c=chunk_c)

    # Honest VMEM accounting: 2-deep pipelined x + lane-padded target blocks,
    # double-buffered (8,128) outputs, f32 chunk temporaries, plus headroom for
    # compiler-internal scratch.  Capped v7x-safe (<= 48 MiB).
    tile_bytes = (2 * tile_n * c * itemsize            # x (double-buffered)
                  + 2 * tile_n * 128 * 4               # target, lane-padded
                  + 2 * 8 * 128 * 4                    # output partials
                  + 4 * tile_n * min(chunk_c, c) * 4)  # f32 chunk temps
    vmem_limit = int(min(48 << 20, tile_bytes + (8 << 20)))

    cost = pl.CostEstimate(
        flops=8 * n * c,
        transcendentals=n * c + n,            # exp per element + log per row
        bytes_accessed=n * c * itemsize + n * 4 + num_tiles * 8 * 128 * 4,
    )

    partials = pl.pallas_call(
        kernel,
        out_shape=jax.ShapeDtypeStruct((num_tiles * 8, 128), jnp.float32),
        grid_spec=pltpu.PrefetchScalarGridSpec(
            num_scalar_prefetch=0,
            grid=(num_tiles,),
            in_specs=[
                pl.BlockSpec((tile_n, c), lambda i: (i, 0)),
                pl.BlockSpec((tile_n, 1), lambda i: (i, 0)),
            ],
            out_specs=pl.BlockSpec((8, 128), lambda i: (i, 0)),
        ),
        compiler_params=pltpu.CompilerParams(
            dimension_semantics=("parallel",),
            vmem_limit_bytes=vmem_limit,
        ),
        cost_estimate=cost,
    )(x, tgt2d)

    # Tiny final reduction outside the kernel (keeps the grid axis parallel).
    return jnp.sum(partials[::8, 0]) / n


def _reference(x, target, smoothing):
    logprobs = jax.nn.log_softmax(x.astype(jnp.float32), axis=-1)
    nll = -jnp.take_along_axis(logprobs, target[:, None], axis=-1)[:, 0]
    smooth = -jnp.mean(logprobs, axis=-1)
    loss = (1.0 - smoothing) * nll + smoothing * smooth
    return jnp.mean(loss)


if __name__ == "__main__":
    key = jax.random.PRNGKey(0)
    kx, kt = jax.random.split(key)

    N, C = 24, 256          # small demo: 24 rows, 256 classes
    smoothing = 0.1

    x = jax.random.normal(kx, (N, C), dtype=jnp.float32)
    target = jax.random.randint(kt, (N,), 0, C, dtype=jnp.int32)

    ref = _reference(x, target, smoothing)

    # Multi-tile + ragged last tile + chunked-C fori_loop path
    # (24 rows / 16-row tiles, 256 classes / 128-lane chunks).
    loss = jax.block_until_ready(
        label_smoothing_loss(x, target, smoothing=smoothing,
                             tile_n=16, chunk_c=128))
    assert jnp.allclose(loss, ref, atol=1e-5, rtol=1e-5), (loss, ref)

    # Auto-tiled path (>=2 tiles guaranteed, single static C chunk).
    loss2 = jax.block_until_ready(
        label_smoothing_loss(x, target, smoothing=smoothing))
    assert jnp.allclose(loss2, ref, atol=1e-5, rtol=1e-5), (loss2, ref)

    # bf16 input path (upcast happens per chunk inside the kernel).
    xb = x.astype(jnp.bfloat16)
    refb = _reference(xb, target, smoothing)
    loss3 = jax.block_until_ready(
        label_smoothing_loss(xb, target, smoothing=smoothing))
    assert jnp.allclose(loss3, refb, atol=1e-3, rtol=1e-3), (loss3, refb)

    print("KERNEL_OK")
</pallas_src>

<mosaic_0001>
module attributes {stable_mosaic.version = 11 : i64} {
  func.func @_label_smoothing_kernel(%arg0: i32, %arg1: memref<16x256xf32, #tpu.memory_space<vmem>>, %arg2: memref<16x1xi32, #tpu.memory_space<vmem>>, %arg3: memref<8x128xf32, #tpu.memory_space<vmem>>) attributes {dimension_semantics = [#tpu.dimension_semantics<parallel>], iteration_bounds = array<i64: 2>, scalar_prefetch = 0 : i64, scratch_operands = 0 : i64, tpu.core_type = #tpu.core_type<tc>, window_params = [{transform_indices = @transform_0, window_bounds = array<i64: 16, 256>}, {transform_indices = @transform_1, window_bounds = array<i64: 16, 1>}, {transform_indices = @transform_2, window_bounds = array<i64: 8, 128>}]} {
    %c0 = arith.constant 0 : index
    %c0_0 = arith.constant 0 : index
    %0 = vector.load %arg2[%c0, %c0_0] : memref<16x1xi32, #tpu.memory_space<vmem>>, vector<16x1xi32>
    %cst = arith.constant 0xFF800000 : f32
    %1 = vector.broadcast %cst : f32 to vector<16x1xf32>
    %cst_1 = arith.constant 0.000000e+00 : f32
    %2 = vector.broadcast %cst_1 : f32 to vector<16x1xf32>
    %3 = tpu.iota {dimensions = array<i32: 1>} : vector<16x128xi32>
    %c0_i32 = arith.constant 0 : i32
    %c128_i32 = arith.constant 128 : i32
    %4 = arith.muli %c0_i32, %c128_i32 : i32
    %5 = tpu.assume_multiple %4, 128 : i32
    %c0_2 = arith.constant 0 : index
    %6 = arith.index_cast %5 : i32 to index
    %7 = vector.load %arg1[%c0_2, %6] : memref<16x256xf32, #tpu.memory_space<vmem>>, vector<16x128xf32>
    %cst_3 = arith.constant dense<0xFF800000> : vector<16xf32>
    %8 = vector.multi_reduction <maximumf>, %7, %cst_3 [1] : vector<16x128xf32> to vector<16xf32>
    %9 = vector.shape_cast %8 : vector<16xf32> to vector<16x1xf32>
    %cst_4 = arith.constant dense<0.000000e+00> : vector<16xf32>
    %10 = vector.multi_reduction <add>, %7, %cst_4 [1] : vector<16x128xf32> to vector<16xf32>
    %11 = vector.shape_cast %10 : vector<16xf32> to vector<16x1xf32>
    %12 = vector.broadcast %5 : i32 to vector<16x128xi32>
    %13 = arith.addi %3, %12 : vector<16x128xi32>
    %14 = vector.broadcast %0 : vector<16x1xi32> to vector<16x128xi32>
    %15 = arith.cmpi eq, %13, %14 : vector<16x128xi32>
    %cst_5 = arith.constant 0.000000e+00 : f32
    %16 = vector.broadcast %cst_5 : f32 to vector<16x128xf32>
    %17 = arith.select %15, %7, %16 : vector<16x128xi1>, vector<16x128xf32>
    %cst_6 = arith.constant dense<0.000000e+00> : vector<16xf32>
    %18 = vector.multi_reduction <add>, %17, %cst_6 [1] : vector<16x128xf32> to vector<16xf32>
    %19 = vector.shape_cast %18 : vector<16xf32> to vector<16x1xf32>
    %20 = arith.maximumf %1, %9 : vector<16x1xf32>
    %21 = arith.addf %2, %11 : vector<16x1xf32>
    %22 = arith.addf %2, %19 : vector<16x1xf32>
    %c1_i32 = arith.constant 1 : i32
    %c128_i32_7 = arith.constant 128 : i32
    %23 = arith.muli %c1_i32, %c128_i32_7 : i32
    %24 = tpu.assume_multiple %23, 128 : i32
    %c0_8 = arith.constant 0 : index
    %25 = arith.index_cast %24 : i32 to index
    %26 = vector.load %arg1[%c0_8, %25] : memref<16x256xf32, #tpu.memory_space<vmem>>, vector<16x128xf32>
    %cst_9 = arith.constant dense<0xFF800000> : vector<16xf32>
    %27 = vector.multi_reduction <maximumf>, %26, %cst_9 [1] : vector<16x128xf32> to vector<16xf32>
    %28 = vector.shape_cast %27 : vector<16xf32> to vector<16x1xf32>
    %cst_10 = arith.constant dense<0.000000e+00> : vector<16xf32>
    %29 = vector.multi_reduction <add>, %26, %cst_10 [1] : vector<16x128xf32> to vector<16xf32>
    %30 = vector.shape_cast %29 : vector<16xf32> to vector<16x1xf32>
    %31 = vector.broadcast %24 : i32 to vector<16x128xi32>
    %32 = arith.addi %3, %31 : vector<16x128xi32>
    %33 = vector.broadcast %0 : vector<16x1xi32> to vector<16x128xi32>
    %34 = arith.cmpi eq, %32, %33 : vector<16x128xi32>
    %cst_11 = arith.constant 0.000000e+00 : f32
    %35 = vector.broadcast %cst_11 : f32 to vector<16x128xf32>
    %36 = arith.select %34, %26, %35 : vector<16x128xi1>, vector<16x128xf32>
    %cst_12 = arith.constant dense<0.000000e+00> : vector<16xf32>
    %37 = vector.multi_reduction <add>, %36, %cst_12 [1] : vector<16x128xf32> to vector<16xf32>
    %38 = vector.shape_cast %37 : vector<16xf32> to vector<16x1xf32>
    %39 = arith.maximumf %20, %28 : vector<16x1xf32>
    %40 = arith.addf %21, %30 : vector<16x1xf32>
    %41 = arith.addf %22, %38 : vector<16x1xf32>
    %c2_i32 = arith.constant 2 : i32
    %c0_i32_13 = arith.constant 0 : i32
    %c128_i32_14 = arith.constant 128 : i32
    %42 = arith.muli %c0_i32_13, %c128_i32_14 : i32
    %43 = tpu.assume_multiple %42, 128 : i32
    %c0_15 = arith.constant 0 : index
    %44 = arith.index_cast %43 : i32 to index
    %45 = vector.load %arg1[%c0_15, %44] : memref<16x256xf32, #tpu.memory_space<vmem>>, vector<16x128xf32>
    %46 = vector.broadcast %39 : vector<16x1xf32> to vector<16x128xf32>
    %47 = arith.subf %45, %46 : vector<16x128xf32>
    %48 = math.exp %47 : vector<16x128xf32>
    %cst_16 = arith.constant dense<0.000000e+00> : vector<16xf32>
    %49 = vector.multi_reduction <add>, %48, %cst_16 [1] : vector<16x128xf32> to vector<16xf32>
    %50 = vector.shape_cast %49 : vector<16xf32> to vector<16x1xf32>
    %51 = arith.addf %2, %50 : vector<16x1xf32>
    %c1_i32_17 = arith.constant 1 : i32
    %c128_i32_18 = arith.constant 128 : i32
    %52 = arith.muli %c1_i32_17, %c128_i32_18 : i32
    %53 = tpu.assume_multiple %52, 128 : i32
    %c0_19 = arith.constant 0 : index
    %54 = arith.index_cast %53 : i32 to index
    %55 = vector.load %arg1[%c0_19, %54] : memref<16x256xf32, #tpu.memory_space<vmem>>, vector<16x128xf32>
    %56 = vector.broadcast %39 : vector<16x1xf32> to vector<16x128xf32>
    %57 = arith.subf %55, %56 : vector<16x128xf32>
    %58 = math.exp %57 : vector<16x128xf32>
    %cst_20 = arith.constant dense<0.000000e+00> : vector<16xf32>
    %59 = vector.multi_reduction <add>, %58, %cst_20 [1] : vector<16x128xf32> to vector<16xf32>
    %60 = vector.shape_cast %59 : vector<16xf32> to vector<16x1xf32>
    %61 = arith.addf %51, %60 : vector<16x1xf32>
    %c2_i32_21 = arith.constant 2 : i32
    %62 = math.log %61 : vector<16x1xf32>
    %63 = arith.addf %39, %62 : vector<16x1xf32>
    %cst_22 = arith.constant 0.899999976 : f32
    %64 = vector.broadcast %cst_22 : f32 to vector<16x1xf32>
    %65 = arith.mulf %64, %41 : vector<16x1xf32>
    %66 = arith.subf %63, %65 : vector<16x1xf32>
    %cst_23 = arith.constant 3.906250e-04 : f32
    %67 = vector.broadcast %cst_23 : f32 to vector<16x1xf32>
    %68 = arith.mulf %67, %40 : vector<16x1xf32>
    %69 = arith.subf %66, %68 : vector<16x1xf32>
    %70 = tpu.iota {dimensions = array<i32: 0>} : vector<16x1xi32>
    %c16_i32 = arith.constant 16 : i32
    %71 = arith.muli %arg0, %c16_i32 : i32
    %72 = vector.broadcast %71 : i32 to vector<16x1xi32>
    %73 = arith.addi %70, %72 : vector<16x1xi32>
    %c24_i32 = arith.constant 24 : i32
    %74 = vector.broadcast %c24_i32 : i32 to vector<16x1xi32>
    %75 = arith.cmpi slt, %73, %74 : vector<16x1xi32>
    %cst_24 = arith.constant 0.000000e+00 : f32
    %76 = vector.broadcast %cst_24 : f32 to vector<16x1xf32>
    %77 = arith.select %75, %69, %76 : vector<16x1xi1>, vector<16x1xf32>
    %78 = vector.shape_cast %77 : vector<16x1xf32> to vector<1x16x1xf32>
    %cst_25 = arith.constant dense<0.000000e+00> : vector<1xf32>
    %79 = vector.multi_reduction <add>, %78, %cst_25 [1, 2] : vector<1x16x1xf32> to vector<1xf32>
    %80 = vector.shape_cast %79 : vector<1xf32> to vector<1x1x1xf32>
    %81 = vector.extract %80[0, 0, 0] : f32 from vector<1x1x1xf32>
    %82 = vector.broadcast %81 : f32 to vector<8x128xf32>
    %c0_26 = arith.constant 0 : index
    %c0_27 = arith.constant 0 : index
    %83 = vector.load %arg3[%c0_26, %c0_27] : memref<8x128xf32, #tpu.memory_space<vmem>>, vector<8x128xf32>
    tpu.vector_store %arg3[%c0_26, %c0_27], %82 {strides = array<i32>} : memref<8x128xf32, #tpu.memory_space<vmem>>, vector<8x128xf32>,
    return
  }
  func.func @transform_0(%arg0: i32) -> (i32, i32) {
    %c0_i32 = arith.constant 0 : i32
    %c0_i32_0 = arith.constant 0 : i32
    return %arg0, %c0_i32 : i32, i32
  }
  func.func @transform_1(%arg0: i32) -> (i32, i32) {
    %c0_i32 = arith.constant 0 : i32
    %c0_i32_0 = arith.constant 0 : i32
    return %arg0, %c0_i32 : i32, i32
  }
  func.func @transform_2(%arg0: i32) -> (i32, i32) {
    %c0_i32 = arith.constant 0 : i32
    %c0_i32_0 = arith.constant 0 : i32
    return %arg0, %c0_i32 : i32, i32
  }
}

</mosaic_0001>

<bundles_post_ra>
// kernel: tpu_custom_call.1
= control target key start
LH: loop header
LB: loop body
LE: loop exit
PB: predicated region body
PF: predicated region fallthrough
CT: control target
= control target key end

     0   :  { %7 = vsyncpa [#allocation3], 0  ;;  %s813_s0 = inlined_call_operand.hbm [shape: f32[24,256], index: 0, kind: input, shape index: {}]   ;;  %s814_s1 = inlined_call_operand.vmem [shape: s32[24,1], index: 1, kind: input, shape index: {}]   ;;  %s815_s2 = inlined_call_operand.hbm [shape: f32[16,128], index: 2, kind: output, shape index: {}]  }
   0x1   :  { %9 = vsyncpa [#allocation3 + $0x1], 0 }
   0x2   :  { %10 = vsyncpa [#allocation4], 0 }
   0x3   :  { %12 = vsyncpa [#allocation4 + $0x1], 0  ;;  %s641_s9 = smov 0   ;;  %s643_s10 = smov 0  }
   0x4   :  { %s645_s11 = smov 0   ;;  %s647_s12 = smov 0  }
   0x5 LB: > { %s662_s13 = sadd.s32 4294967295, %s619_s12   ;;  %s439_s14 = sadd.s32 4294967294, %s619_s12   ;;  %s619_s12 = sphi %s647_s12, %s825_s12   ;;  %s615_s11 = sphi %s645_s11, %s824_s11   ;;  %s611_s10 = sphi %s643_s10, %s823_s10   ;;  %s607_s9 = sphi %s641_s9, %s822_s9  }
   0x6   : > { %s666_s15 = sadd.s32 1, %s619_s12   ;;  %s25_s16 = sadd.s32 1, %s615_s11 }
   0x7   : > { %s22_s17 = ssub.s32 %s619_s12, %s666_s15  ;;  %p32_p0 = scmp.ne.s32.totalorder %s615_s11, %s611_s10 }
   0x8   : > { %p23_p1 = scmp.eq.s32.totalorder %s22_s17, 0  ;;  %p33_p2 = scmp.eq.s32.totalorder %s619_s12, 0 }
   0x9   : > { %p38_p3 = scmp.ne.s32.totalorder %s611_s10, %s607_s9  ;;  %p39_p4 = scmp.eq.s32.totalorder %s662_s13, 0 }
   0xa   : > { %s678_s18 = scalar_select %p23_p1, %s615_s11, %s25_s16  }
   0xb   : > { %p34_p5 = por %p33_p2, %p32_p0  ;;  %p680_p6 = por %p39_p4, %p38_p3 }
   0xc   : > { %p88_p7 = scmp.eq.s32.totalorder %s662_s13, 1  ;;  %p94_p8 = scmp.eq.s32.totalorder %s439_s14, 1 }
   0xd   : > { %p816_p11 = scmp.ge.s32.totalorder %s619_s12, 2 }
   0xe   : > { %p685_p9 = por %p88_p7, %p32_p0  ;;  %p689_p10 = por %p94_p8, %p38_p3 }
   0xf   : > { %110 = sbr.rel (%p816_p11) target bundleno = 57 (0x39), region = 16 }
  0x10   : > { %s819_s21 = scalar_select %p689_p10, 1, 0 }
  0x16   : > { %113 = sbr.rel (!%p34_p5) target bundleno = 57 (0x39), region = 20  ;;  %s114_s22 = sand.u32 (%p34_p5), 1, %s615_s11  }
  0x17   : > { %s443_s23 = sshll.u32 (%p34_p5), %s619_s12, 1  ;;  %s442_s24 = sshll.u32 (%p34_p5), %s114_s22, 5 }
  0x18   : > { %s120_s25 = ssub.s32 (%p34_p5), 3, %s443_s23  ;;  %s701_s28 = scalar_lea.sflag (%p34_p5), [#allocation3], %s114_s22 }
  0x19   : > { %p121_p12 = scmp.lt.s32.totalorder (%p34_p5), %s120_s25, 2  ;;  %s118_s29 = scalar_lea.vmem (%p34_p5), [#allocation2], %s442_s24 }
  0x1d   : > { %s827_s25 = smov (!%p121_p12, %s120_s25), 2 }
  0x1e   : > { %s698_s26 = sshll.u32 %s827_s25, 8 }
  0x1f   : > { %s126_s27 = ssub.s32 512, %s698_s26 }
  0x20   : > { %127 = vsyncadd %s701_s28, %s126_s27  ;;  %p446_p13 = scmp.ne.s32.totalorder %s698_s26, 0  ;;  %s465_s30 = sshll.u32 %s619_s12, 9 }
  0x21   : > { %s709_s5 = scalar_lea.hbm %s813_s0, %s465_s30  ;;  %s133_s6 = sshll.u32 %s118_s29, 4  ;;  %s711_s6 = int_to_ptr.vmem [resolvable:$true] %s133_s6 }
  0x22   : > { %s525_s7 = scalar_lea.hbm %s709_s5, %s698_s26  ;;  %s529_s16 = scalar_lea.hbm %s813_s0, 768 }
  0x23   : > { %p526_p0 = scmp.ne.s32.totalorder %s709_s5, %s525_s7  ;;  %p530_p3 = scmp.lt.u32.totalorder %s709_s5, %s813_s0 }
  0x24   : > { %p531_p4 = scmp.lt.u32.totalorder %s529_s16, %s525_s7  ;;  %p533_p7 = scmp.lt.u32.totalorder %s525_s7, %s709_s5 }
  0x25   : > { %p527_p1 = pnand %p526_p0, %p446_p13 }
  0x26   : > { %p532_p5 = por %p531_p4, %p530_p3 }
  0x27   : > { %p528_p2 = pneg %p527_p1 }
  0x28   : > { %p534_p8 = por %p533_p7, %p532_p5 }
  0x2a   : > { %p535_p12 = pnand %p534_p8, %p528_p2 }
  0x2c   : > { %538 = shalt.err (!%p535_p12)
}
  0x2d   : > { %s539_s23 = scalar_lea.vmem %s711_s6, %s698_s26  ;;  %s621_s24 = smov [#allocation2]  }
  0x2e   : > { %p540_p0 = scmp.ne.s32.totalorder %s711_s6, %s539_s23  ;;  %s543_s25 = sshll.u32 %s621_s24, 4  ;;  %s544_s25 = int_to_ptr.vmem [resolvable:$false] %s543_s25 }
  0x2f   : > { %s545_s27 = scalar_lea.vmem %s544_s25, 1024  ;;  %p546_p10 = scmp.lt.s32.totalorder %s711_s6, %s544_s25 }
  0x30   : > { %p541_p1 = pnand %p540_p0, %p446_p13  ;;  %p547_p3 = scmp.lt.s32.totalorder %s545_s27, %s539_s23 }
  0x32   : > { %p542_p11 = pneg %p541_p1  ;;  %p548_p4 = por %p547_p3, %p546_p10 }
  0x34   : > { %p549_p5 = pnand %p548_p4, %p542_p11 }
  0x36   : > { %552 = shalt.err (!%p549_p5)
}
  0x37   : > { %s622_s29 = smov 256   ;;  %s623_s30 = smov 16  }
  0x38   : > { %139 = dma.hbm_to_vmem [thread:$0]  (%p446_p13), %s709_s5, %s698_s26, %s711_s6, %s701_s28, %s622_s29, %s622_s29, %s623_s30  }
  0x39 PF: > { %p451_p2 = scmp.ge.s32.totalorder %s619_s12, 1  ;;  %p158_p7 = scmp.lt.s32.totalorder %s619_s12, 3 }
  0x3b   : > { %p159_p8 = pnand %p451_p2, %p158_p7 }
  0x3c   : > { %s741_s3 = sand.u32 (!%p159_p8), 1, %s611_s10  }
  0x3d   : > { %162 = sbr.rel (%p159_p8) target bundleno = 633 (0x279), region = 28  ;;  %s452_s4 = sshll.u32 (!%p159_p8), %s741_s3, 5 }
  0x3e   : > { %s165_s7 = scalar_lea.sflag (!%p159_p8), [#allocation3], %s741_s3  ;;  %s168_s8 = scalar_lea.vmem (!%p159_p8), [#allocation2], %s452_s4 }
  0x44   : > { %598 = dma.done.wait (%p680_p6), %s165_s7, 512  }
  0x45   : > { %600 = vsyncadd (%p680_p6), %s165_s7, 4294966784  ;;  %v624_v0 = vmov 0   ;;  %v456_v1 = vld [vmem:[%s168_s8 + $0x8] sm:$0xff]  ;;  %v222_v2 = vld [vmem:[%s168_s8] sm:$0xff]  ;;  %s454_s26 = sshll.u32 %s662_s13, 1  ;;  %v220_v17 = vlaneseq  ;;  %s458_s14 = sshll.u32 %s662_s13, 4 }
  0x46   : > { %511 = vset.pattern.permute.xlu0 %v624_v0  ;;  %512 = vset.pattern.permute.xlu1 %v624_v0  ;;  %v457_v3 = vld [vmem:[%s168_s8 + $0x18] sm:$0xff]  ;;  %v223_v4 = vld [vmem:[%s168_s8 + $0x10] sm:$0xff]  ;;  %p209_p10 = scmp.lt.s32.totalorder %s454_s26, 2  ;;  %v321_v51 = vstv %s458_s14  ;;  %vm328_vm6 = vcmask 7168   ;;  %s453_s16 = sshll.u32 %s741_s3, 3 }
  0x47   : > { %255 = vmax.xlane.f32.xlu1 %v456_v1  ;;  %224 = vmax.xlane.f32.xlu0 %v222_v2  ;;  %v221_v20 = vand.u32 127, %v220_v17  ;;  %v318_v50 = vshrl.u32 %v220_v17, 7  ;;  %s197_s17 = scalar_lea.vmem [#allocation5], %s453_s16  ;;  %s460_s23 = sshll.u32 %s662_s13, 7 }
  0x48   : > { %s829_s26 = smov (!%p209_p10, %s454_s26), 2  ;;  %s357_s22 = sshll.u32 %s197_s17, 4  ;;  %s766_s22 = int_to_ptr.vmem [resolvable:$true] %s357_s22 }
  0x49   : > { %s455_s28 = sshll.u32 %s829_s26, 3  ;;  %v264_v30 = vadd.s32 128, %v221_v20  ;;  %v319_v56 = vadd.s32 8, %v318_v50  ;;  %v322_v61 = vadd.s32 %v321_v51, %v318_v50  ;;  %s771_s29 = scalar_lea.hbm %s815_s2, %s460_s23 }
  0x4a   : > { %s212_s19 = scalar_lea.vmem %s814_s1, %s455_s28  ;;  %s344_s30 = scalar_lea.sflag [#allocation4], %s741_s3 }
  0x4b   : > { %257 = vmax.xlane.f32.xlu1 %v457_v3  ;;  %226 = vmax.xlane.f32.xlu0 %v223_v4  ;;  %v219_v5 = vld [vmem:[%s212_s19 + $0x8] sm:$0xff]  ;;  %v218_v6 = vld [vmem:[%s212_s19] sm:$0xff]  ;;  %vm324_vm4 = vcmp.lt.s32.totalorder %v322_v61, 24  ;;  %s553_s4 = scalar_lea.vmem %s766_s22, 128  ;;  %s625_s13 = smov [#allocation5]  }
  0x4c   : > { %p554_p6 = scmp.ne.s32.totalorder %s766_s22, %s553_s4  ;;  %s557_s7 = sshll.u32 %s625_s13, 4  ;;  %s558_s7 = int_to_ptr.vmem [resolvable:$false] %s557_s7 }
  0x4d   : > { %s559_s8 = scalar_lea.vmem %s558_s7, 256  ;;  %p560_p12 = scmp.lt.s32.totalorder %s766_s22, %s558_s7 }
  0x4e   : > { %p555_p11 = pnand %p554_p6, %p685_p9  ;;  %p561_p0 = scmp.lt.s32.totalorder %s559_s8, %s553_s4 }
  0x50   : > { %p556_p13 = pneg %p555_p11  ;;  %p562_p1 = por %p561_p0, %p560_p12 }
  0x52   : > { %p563_p3 = pnand %p562_p1, %p556_p13 }
  0x5c   : > { %238 = vperm.xlu1 %512, %v219_v5  }
  0x61   : > { %235 = vperm.xlu0 %511, %v218_v6  }
  0xd4   : > { %v256_v7 = vpop.xlane.xlu1 %255  ;;  %v225_v8 = vpop.xlane.xlu0 %224 }
  0xd5   : > { %v753_v9 = vmax.f32 %v225_v8, %v256_v7 }
  0xd7   : > { %v279_v10 = vsub.f32 %v222_v2, %v753_v9  ;;  %v291_v18 = vsub.f32 %v456_v1, %v753_v9 }
  0xd8   : > { %v258_v11 = vpop.xlane.xlu1 %257  ;;  %v227_v12 = vpop.xlane.xlu0 %226 }
  0xd9   : > { %v281_v13 = vmul.f32 1.442695, %v279_v10  ;;  %v756_v14 = vmax.f32 %v227_v12, %v258_v11  ;;  %v293_v21 = vmul.f32 1.442695, %v291_v18 }
  0xdb   : > { %513 = vpow2.f32 %v281_v13  ;;  %v280_v15 = vsub.f32 %v223_v4, %v756_v14  ;;  %v292_v22 = vsub.f32 %v457_v3, %v756_v14 }
  0xdc   : > { %v239_v24 = vpop.permute.xlu1 %238 }
  0xdd   : > { %v283_v16 = vmul.f32 1.442695, %v280_v15  ;;  %v295_v25 = vmul.f32 1.442695, %v292_v22  ;;  %vm241_vm1 = vcmp.eq.s32.totalorder %v221_v20, %v239_v24  ;;  %vm266_vm3 = vcmp.eq.s32.totalorder %v264_v30, %v239_v24 }
  0xde   : > { %v243_v28 = vsel %vm241_vm1, %v223_v4, 0.0  ;;  %v268_v33 = vsel %vm266_vm3, %v457_v3, 0.0 }
  0xdf   : > { %515 = vpow2.f32 %v283_v16 }
  0xe0   : > { %v236_v19 = vpop.permute.xlu0 %235  ;;  %517 = vpow2.f32 %v293_v21 }
  0xe1   : > { %vm240_vm0 = vcmp.eq.s32.totalorder %v221_v20, %v236_v19  ;;  %519 = vpow2.f32 %v295_v25  ;;  %vm265_vm2 = vcmp.eq.s32.totalorder %v264_v30, %v236_v19 }
  0xe2   : > { %v242_v26 = vsel %vm240_vm0, %v222_v2, 0.0  ;;  %v267_v32 = vsel %vm265_vm2, %v456_v1, 0.0 }
  0xe5   : > { %v514_v23 = vpop.eup %513 }
  0xe6   : > { %285 = vadd.xlane.f32.xlu1 %v514_v23 }
  0xe9   : > { %v516_v27 = vpop.eup %515 }
  0xea   : > { %244 = vadd.xlane.f32.xlu1 %v242_v26  ;;  %287 = vadd.xlane.f32.xlu0 %v516_v27  ;;  %v518_v29 = vpop.eup %517 }
  0xeb   : > { %v520_v31 = vpop.eup %519 }
  0xee   : > { %246 = vadd.xlane.f32.xlu1 %v243_v28  ;;  %228 = vadd.xlane.f32.xlu0 %v222_v2 }
  0xf2   : > { %297 = vadd.xlane.f32.xlu1 %v518_v29  ;;  %259 = vadd.xlane.f32.xlu0 %v456_v1  ;;  %v323_v1 = vadd.s32 %v321_v51, %v319_v56 }
  0xf4   : > { %vm325_vm5 = vcmp.lt.s32.totalorder %v323_v1, 24 }
  0xf6   : > { %299 = vadd.xlane.f32.xlu1 %v520_v31 }
  0xfa   : > { %269 = vadd.xlane.f32.xlu1 %v267_v32 }
  0xfe   : > { %271 = vadd.xlane.f32.xlu1 %v268_v33 }
 0x102   : > { %230 = vadd.xlane.f32.xlu1 %v223_v4 }
 0x106   : > { %261 = vadd.xlane.f32.xlu1 %v457_v3 }
 0x173   : > { %v286_v34 = vpop.xlane.xlu1 %285 }
 0x177   : > { %v245_v35 = vpop.xlane.xlu1 %244  ;;  %v288_v37 = vpop.xlane.xlu0 %287 }
 0x17b   : > { %v247_v36 = vpop.xlane.xlu1 %246  ;;  %v229_v41 = vpop.xlane.xlu0 %228 }
 0x17f   : > { %v298_v38 = vpop.xlane.xlu1 %297  ;;  %v260_v44 = vpop.xlane.xlu0 %259 }
 0x180   : > { %v301_v39 = vadd.f32 %v298_v38, %v286_v34  ;;  %v275_v48 = vadd.f32 %v260_v44, %v229_v41 }
 0x182   : > { %521 = vlog2.f32 %v301_v39  ;;  %v313_v58 = vmul.f32 0.000390625, %v275_v48 }
 0x183   : > { %v300_v40 = vpop.xlane.xlu1 %299 }
 0x184   : > { %v302_v42 = vadd.f32 %v300_v40, %v288_v37 }
 0x186   : > { %523 = vlog2.f32 %v302_v42 }
 0x187   : > { %v270_v43 = vpop.xlane.xlu1 %269 }
 0x188   : > { %v277_v45 = vadd.f32 %v270_v43, %v245_v35 }
 0x18a   : > { %v309_v53 = vmul.f32 0.9, %v277_v45 }
 0x18b   : > { %v272_v46 = vpop.xlane.xlu1 %271 }
 0x18c   : > { %v522_v47 = vpop.eup %521  ;;  %v278_v54 = vadd.f32 %v272_v46, %v247_v36 }
 0x18d   : > { %v304_v49 = vmul.f32 0.6931472, %v522_v47 }
 0x18e   : > { %v310_v63 = vmul.f32 0.9, %v278_v54 }
 0x18f   : > { %v307_v52 = vadd.f32 %v304_v49, %v753_v9  ;;  %v231_v55 = vpop.xlane.xlu1 %230 }
 0x190   : > { %v524_v57 = vpop.eup %523 }
 0x191   : > { %v306_v59 = vmul.f32 0.6931472, %v524_v57  ;;  %v311_v60 = vsub.f32 %v307_v52, %v309_v53 }
 0x193   : > { %v308_v62 = vadd.f32 %v306_v59, %v756_v14  ;;  %v262_v0 = vpop.xlane.xlu1 %261  ;;  %v315_v2 = vsub.f32 %v311_v60, %v313_v58 }
 0x194   : > { %v276_v3 = vadd.f32 %v262_v0, %v231_v55 }
 0x195   : > { %v312_v4 = vsub.f32 %v308_v62, %v310_v63  ;;  %v326_v7 = vsel %vm324_vm4, %v315_v2, 0.0 }
 0x196   : > { %v314_v5 = vmul.f32 0.000390625, %v276_v3  ;;  %v329_v9 = vsel %vm328_vm6, %v326_v7, 0.0 }
 0x198   : > { %v316_v6 = vsub.f32 %v312_v4, %v314_v5 }
 0x19a   : > { %v327_v8 = vsel %vm325_vm5, %v316_v6, 0.0 }
 0x19b   : > { %v330_v10 = vsel %vm328_vm6, %v327_v8, 0.0 }
 0x19c   : > { %v331_v11 = vadd.f32 %v330_v10, %v329_v9 }
 0x19e   : > { %332 = vadd.xlane.f32.xlu0 %v331_v11 }
 0x22b   : > { %v333_v12 = vpop.xlane.xlu0 %332 }
 0x22c   : > { %v334_v13 = vrot.slane %v333_v12, 4 }
 0x22e   : > { %v335_v14 = vadd.f32 %v334_v13, %v333_v12 }
 0x230   : > { %v336_v15 = vrot.slane %v335_v14, 2 }
 0x232   : > { %v337_v16 = vadd.f32 %v336_v15, %v335_v14 }
 0x234   : > { %v338_v17 = vrot.slane %v337_v16, 1 }
 0x236   : > { %v339_v18 = vadd.f32 %v338_v17, %v337_v16 }
 0x238   : > { %466 = vpush %v339_v18 }
 0x269   : > { %s467_s24 = spop %466 }
 0x26a   : > { %v341_v19 = vstv %s467_s24 }
 0x26b   : > { %342 = vst [vmem:[%s197_s17] sm:$0xff] %v341_v19 }
 0x26c   : > { %566 = shalt.err (!%p563_p3)
}
 0x26d   : > { %s567_s3 = scalar_lea.hbm %s771_s29, 128  ;;  %s571_s5 = scalar_lea.hbm %s815_s2, 256 }
 0x26e   : > { %p568_p4 = scmp.ne.s32.totalorder %s771_s29, %s567_s3  ;;  %p572_p7 = scmp.lt.u32.totalorder %s771_s29, %s815_s2 }
 0x26f   : > { %p573_p8 = scmp.lt.u32.totalorder %s571_s5, %s567_s3  ;;  %p575_p6 = scmp.lt.u32.totalorder %s567_s3, %s771_s29 }
 0x270   : > { %p569_p5 = pnand %p568_p4, %p685_p9 }
 0x271   : > { %p574_p10 = por %p573_p8, %p572_p7 }
 0x272   : > { %p570_p2 = pneg %p569_p5 }
 0x273   : > { %p576_p11 = por %p575_p6, %p574_p10 }
 0x275   : > { %p577_p13 = pnand %p576_p11, %p570_p2 }
 0x277   : > { %580 = shalt.err (!%p577_p13)
}
 0x278   : > { %469 = dma.vmem_to_hbm [thread:$0]  (%p685_p9), %s766_s22, 128, %s771_s29, %s344_s30  }
 0x279 PF: > { %s369_s14 = sand.u32 1, %s607_s9   ;;  %p820_p12 = scmp.ne.s32.totalorder %s819_s21, 0 }
 0x27a   : > { %p821_p0 = scmp.ge.s32.totalorder %s619_s12, 2  ;;  %s370_s16 = scalar_lea.sflag [#allocation4], %s369_s14 }
 0x27c   : > { %p472_p1 = pnand %p821_p0, %p820_p12 }
 0x27e   : > { %602 = dma.done.wait (!%p472_p1), %s370_s16, 128  }
 0x27f   : > { %604 = vsyncadd (!%p472_p1), %s370_s16, 4294967168  ;;  %p15_p3 = scmp.ge.s32.totalorder %s666_s15, 4   ;;  %s822_s9 = smov %s611_s10 }
 0x280   : > { %s823_s10 = smov %s615_s11  ;;  %s824_s11 = smov %s678_s18 }
 0x281   : > { %s825_s12 = smov %s666_s15  ;;  %17 = sbr.rel (!%p15_p3) target bundleno = 5 (0x5), region = 77 }
 0x288   :  { %375 = vsyncpa [#allocation3], 1 }
 0x289   :  { %377 = vsyncpa [#allocation3 + $0x1], 1 }
 0x28a   :  { %378 = vsyncpa [#allocation4], 1 }
 0x28b   :  { %380 = vsyncpa [#allocation4 + $0x1], 1 }

</bundles_post_ra>
